<compile_context>
chip_gen: v5e
topology: v5e:2x2
jax: 0.10.0
libtpu: 0.0.40
codegen_flags: <defaults>
</compile_context>

<pallas_src>
import functools
import math

import jax
import jax.numpy as jnp
from jax import lax
from jax.experimental import pallas as pl
from jax.experimental.pallas import tpu as pltpu


_S_BUDGET_BYTES = 2 * 1024 * 1024  # max size of the resident fold matrix S


def _budgets():
    """(target_block_bytes, vmem_limit_bytes) per TPU generation."""
    try:
        cap = int(pltpu.get_tpu_info().vmem_capacity_bytes)
    except Exception:
        cap = 64 * 1024 * 1024  # conservative (v7x-sized) fallback, safe everywhere
    if cap <= 64 * 1024 * 1024:
        # v7x-class: fastest HBM, smallest VMEM -> 12 MiB blocks, 48 MiB limit.
        return 12 * 1024 * 1024, 48 * 1024 * 1024
    # v5e / v6e: 128 MiB physical VMEM -> 16 MiB blocks, 96 MiB scoped limit
    # (the explicit override matters most on v5e whose default limit is 16 MiB).
    return 16 * 1024 * 1024, 96 * 1024 * 1024


def _sublane_multiple(dtype) -> int:
    return {4: 8, 2: 16, 1: 32}.get(jnp.dtype(dtype).itemsize, 8)


def _acc_dtype(dtype, oper):
    if oper == "max":
        return jnp.dtype(dtype)          # max needs no widening
    if oper == "sum" and not jnp.issubdtype(dtype, jnp.floating):
        # TODO(synk): PyTorch accumulates integer sums in int64.
        return jnp.dtype(dtype)
    return jnp.dtype(jnp.float32)        # float sum / mean accumulate in f32


def _row_tile(G, row_bytes, align, budget):
    """Rows per block: `align`-aligned, sized to `budget`, and always >= 2 grid
    tiles when G allows it (so v7x megacore can split the parallel axis and the
    DMA pipeline has at least two steps)."""
    if G <= align:
        return G                          # full extent -> always a legal block
    tg = max(align, (budget // max(row_bytes, 1)) // align * align)
    half = -(-G // 2)                     # ceil(G / 2)
    cap = -(-half // align) * align       # round up to alignment; cap < G here
    return min(tg, cap)


def _fold_reduce(x, n, width, combine):
    """(rows, n*width) -> (rows, width): combine n lane-contiguous chunks with a
    halving tree.  A non-power-of-two leftover is folded in ONCE up front (single
    concatenate) instead of per round."""
    if n == 1:
        return x
    p = 1 << (n.bit_length() - 1)         # largest power of two <= n
    if p != n:
        rem = n - p
        folded = combine(x[:, : rem * width], x[:, p * width : n * width])
        x = jnp.concatenate([folded, x[:, rem * width : p * width]], axis=-1)
        n = p
    while n > 1:
        h = n // 2
        x = combine(x[:, : h * width], x[:, h * width : n * width])
        n = h
    return x


def _fold_matrix(k, H, W, dtype):
    """Block-diagonal 0/1 matrix S (k*H*W, k*W): (x @ S)[r, g*W+w] = sum_h x[r, g*H*W+h*W+w]."""
    s_seg = jnp.tile(jnp.eye(W, dtype=dtype), (H, 1))          # (H*W, W)
    if k == 1:
        return s_seg
    return jnp.kron(jnp.eye(k, dtype=dtype), s_seg)            # (k*H*W, k*W)


# --------------------------------------------------------------------------
# Grouped path kernels (input (G, k*H*W) -> output (G, k*W))
# --------------------------------------------------------------------------
def _grouped_mxu_kernel(oper, H):
    inv_h = 1.0 / H

    def kernel(x_ref, s_ref, o_ref):
        out = jnp.dot(x_ref[...], s_ref[...], preferred_element_type=jnp.float32)
        if oper == "mean":
            out = out * inv_h
        o_ref[...] = out.astype(o_ref.dtype)

    return kernel


def _grouped_fold_kernel(oper, k, H, W, acc_dt):
    combine = jnp.maximum if oper == "max" else jnp.add
    seg = H * W
    inv_h = 1.0 / H

    def kernel(x_ref, o_ref):
        parts = []
        for g in range(k):                     # small static k -> unrolled at trace time
            xg = x_ref[:, g * seg:(g + 1) * seg].astype(acc_dt)
            parts.append(_fold_reduce(xg, H, W, combine))
        out = parts[0] if k == 1 else jnp.concatenate(parts, axis=-1)   # (tg, k*W)
        if oper == "mean":
            out = out * inv_h
        o_ref[...] = out.astype(o_ref.dtype)

    return kernel


def _agg_grouped(x2, oper, k, H, W, target_bytes, vmem_limit):
    G, L_in = x2.shape
    L_out = k * W
    dtype = x2.dtype
    itemsize = jnp.dtype(dtype).itemsize
    sub = _sublane_multiple(dtype)

    tg = _row_tile(G, L_in * itemsize, sub, target_bytes)
    grid = (pl.cdiv(G, tg),)

    cparams = pltpu.CompilerParams(
        dimension_semantics=("parallel",),
        vmem_limit_bytes=vmem_limit,
    )

    s_bytes = L_in * L_out * itemsize
    use_mxu = (oper in ("mean", "sum")
               and dtype in (jnp.bfloat16, jnp.float16)
               and s_bytes <= _S_BUDGET_BYTES)

    if use_mxu:
        S = _fold_matrix(k, H, W, dtype)
        return pl.pallas_call(
            _grouped_mxu_kernel(oper, H),
            out_shape=jax.ShapeDtypeStruct((G, L_out), dtype),
            grid_spec=pltpu.PrefetchScalarGridSpec(
                num_scalar_prefetch=0,
                grid=grid,
                in_specs=[pl.BlockSpec((tg, L_in), lambda i: (i, 0)),
                          pl.BlockSpec((L_in, L_out), lambda i: (0, 0))],  # resident S
                out_specs=pl.BlockSpec((tg, L_out), lambda i: (i, 0)),
            ),
            compiler_params=cparams,
        )(x2, S)

    return pl.pallas_call(
        _grouped_fold_kernel(oper, k, H, W, _acc_dtype(dtype, oper)),
        out_shape=jax.ShapeDtypeStruct((G, L_out), dtype),
        grid_spec=pltpu.PrefetchScalarGridSpec(
            num_scalar_prefetch=0,
            grid=grid,
            in_specs=[pl.BlockSpec((tg, L_in), lambda i: (i, 0))],
            out_specs=pl.BlockSpec((tg, L_out), lambda i: (i, 0)),
        ),
        compiler_params=cparams,
    )(x2)


# --------------------------------------------------------------------------
# Flat fallback path (input (M, H*W) -> output (M, W)), H tiled with accumulator
# --------------------------------------------------------------------------
def _flat_kernel(oper, H, W, th, HT, acc_dt, need_mask):
    combine = jnp.maximum if oper == "max" else jnp.add
    if oper == "max":
        neutral = -jnp.inf if jnp.issubdtype(acc_dt, jnp.floating) else jnp.iinfo(acc_dt).min
    else:
        neutral = 0
    inv_h = 1.0 / H

    def kernel(x_ref, o_ref, acc_ref):
        j = pl.program_id(1)

        @pl.when(j == 0)
        def _init():
            acc_ref[...] = jnp.full(acc_ref.shape, neutral, dtype=acc_ref.dtype)

        x = x_ref[...].astype(acc_dt)                       # (R, th*W)
        if need_mask:
            # last H-tile is partial: neutralize the out-of-range lanes
            valid_lanes = jnp.minimum(th, H - j * th) * W
            lane = lax.broadcasted_iota(jnp.int32, x.shape, 1)
            x = jnp.where(lane < valid_lanes, x, neutral)
        acc_ref[...] = combine(acc_ref[...], _fold_reduce(x, th, W, combine))

        @pl.when(j == HT - 1)
        def _finish():
            out = acc_ref[...]
            if oper == "mean":
                out = out * inv_h
            o_ref[...] = out.astype(o_ref.dtype)

    return kernel


def _agg_flat(x2, oper, k, H, W, target_bytes, vmem_limit):
    M, _ = x2.shape
    dtype = x2.dtype
    itemsize = jnp.dtype(dtype).itemsize
    sub = _sublane_multiple(dtype)
    acc_dt = _acc_dtype(dtype, oper)

    lane_bytes = H * W * itemsize
    if sub * lane_bytes <= target_bytes:
        # full H fits in one block: single H-tile, size the row tile to budget
        th = H
        R = _row_tile(M, lane_bytes, sub, target_bytes)
    else:
        # huge H*W: tile the lane axis in th*W chunks (th multiple of k -> %128)
        th = max(k, (target_bytes // (sub * W * itemsize)) // k * k)
        th = min(th, H)
        R = M if M <= sub else sub
    HT = pl.cdiv(H, th)
    need_mask = (th < H) and (H % th != 0)

    grid = (pl.cdiv(M, R), HT)

    return pl.pallas_call(
        _flat_kernel(oper, H, W, th, HT, acc_dt, need_mask),
        out_shape=jax.ShapeDtypeStruct((M, W), dtype),
        grid_spec=pltpu.PrefetchScalarGridSpec(
            num_scalar_prefetch=0,
            grid=grid,
            in_specs=[pl.BlockSpec((R, th * W), lambda i, j: (i, j))],
            out_specs=pl.BlockSpec((R, W), lambda i, j: (i, 0)),
            scratch_shapes=[pltpu.VMEM((R, W), acc_dt)],
        ),
        compiler_params=pltpu.CompilerParams(
            dimension_semantics=("parallel", "arbitrary"),
            vmem_limit_bytes=vmem_limit,
        ),
    )(x2)


# --------------------------------------------------------------------------
# Public wrapper
# --------------------------------------------------------------------------
@functools.partial(jax.jit, static_argnames=("oper", "block_bytes"))
def aggregator(x: jax.Array, oper: str, block_bytes=None) -> jax.Array:
    """Pallas equivalent of Aggregator(oper)(x, dim=2) for a 4-D NCHW tensor."""
    assert oper in ("mean", "sum", "max")
    assert x.ndim == 4, "expects NCHW input; reduces dim=2"
    B, C, H, W = x.shape
    M = B * C
    itemsize = jnp.dtype(x.dtype).itemsize
    sub = _sublane_multiple(x.dtype)

    # Row-grouping factor: smallest k with k*W % 128 == 0 (lane-dense output).
    k = math.lcm(W, 128) // W

    target_bytes, vmem_limit = _budgets()
    if block_bytes is not None:               # test hook: force small blocks
        target_bytes = int(block_bytes)

    grouped_ok = (M % k == 0) and (sub * k * H * W * itemsize <= target_bytes)
    if grouped_ok:
        out2 = _agg_grouped(x.reshape(M // k, k * H * W), oper, k, H, W,
                            target_bytes, vmem_limit)        # (M//k, k*W)
    else:
        out2 = _agg_flat(x.reshape(M, H * W), oper, k, H, W,
                         target_bytes, vmem_limit)            # (M, W)
    return out2.reshape(B, C, W)


if __name__ == "__main__":
    key = jax.random.PRNGKey(0)
    keys = jax.random.split(key, 5)

    # (input, forced block_bytes, atol, rtol)
    cases = [
        # grouped path, f32 -> VPU fold kernels
        (jax.random.normal(keys[0], (2, 4, 16, 16), dtype=jnp.float32), None, 1e-4, 1e-5),
        # grouped path, bf16 -> MXU matmul (sum/mean) + fold (max)
        (jax.random.normal(keys[1], (2, 4, 16, 16), dtype=jnp.float32).astype(jnp.bfloat16),
         None, 2e-2, 2e-2),
        # ragged M (68 % 8 != 0) -> flat path, single H tile
        (jax.random.normal(keys[2], (1, 68, 16, 16), dtype=jnp.float32), None, 1e-4, 1e-5),
        # tiny ragged M -> flat path, full-extent row block
        (jax.random.normal(keys[3], (2, 3, 16, 16), dtype=jnp.float32), None, 1e-4, 1e-5),
        # forced tiny block budget -> flat path with H tiling + accumulator + tail mask
        (jax.random.normal(keys[4], (1, 2, 200, 16), dtype=jnp.float32), 16 * 1024, 1e-4, 1e-5),
    ]

    refs = {
        "mean": lambda a: jnp.mean(a.astype(jnp.float32), axis=2),
        "sum": lambda a: jnp.sum(a.astype(jnp.float32), axis=2),
        "max": lambda a: jnp.max(a.astype(jnp.float32), axis=2),
    }

    ok = True
    for oper in ("mean", "sum", "max"):
        for inp, bb, atol, rtol in cases:
            out = jax.block_until_ready(aggregator(inp, oper, block_bytes=bb))
            ref = refs[oper](inp)
            if out.shape != ref.shape:
                ok = False
                print(f"SHAPE MISMATCH oper={oper} in={inp.shape} out={out.shape}")
                continue
            if not jnp.allclose(out.astype(jnp.float32), ref, atol=atol, rtol=rtol):
                ok = False
                print(f"VALUE MISMATCH oper={oper} in={inp.shape} dtype={inp.dtype}")

    if ok:
        print("KERNEL_OK")
</pallas_src>

<mosaic_0001>
module attributes {stable_mosaic.version = 11 : i64} {
  func.func @kernel(%arg0: i32, %arg1: memref<1x2048xf32, #tpu.memory_space<vmem>>, %arg2: memref<1x128xf32, #tpu.memory_space<vmem>>) attributes {dimension_semantics = [#tpu.dimension_semantics<parallel>], iteration_bounds = array<i64: 1>, scalar_prefetch = 0 : i64, scratch_operands = 0 : i64, tpu.core_type = #tpu.core_type<tc>, window_params = [{transform_indices = @transform_0, window_bounds = array<i64: 1, 2048>}, {transform_indices = @transform_1, window_bounds = array<i64: 1, 128>}]} {
    %c0 = arith.constant 0 : index
    %c0_0 = arith.constant 0 : index
    %0 = vector.load %arg1[%c0, %c0_0] : memref<1x2048xf32, #tpu.memory_space<vmem>>, vector<1x256xf32>
    %1 = vector.extract_strided_slice %0 {offsets = [0, 0], sizes = [1, 128], strides = [1, 1]} : vector<1x256xf32> to vector<1x128xf32>
    %2 = vector.extract_strided_slice %0 {offsets = [0, 128], sizes = [1, 128], strides = [1, 1]} : vector<1x256xf32> to vector<1x128xf32>
    %3 = arith.addf %1, %2 : vector<1x128xf32>
    %4 = vector.extract_strided_slice %3 {offsets = [0, 0], sizes = [1, 64], strides = [1, 1]} : vector<1x128xf32> to vector<1x64xf32>
    %5 = vector.extract_strided_slice %3 {offsets = [0, 64], sizes = [1, 64], strides = [1, 1]} : vector<1x128xf32> to vector<1x64xf32>
    %6 = arith.addf %4, %5 : vector<1x64xf32>
    %7 = vector.extract_strided_slice %6 {offsets = [0, 0], sizes = [1, 32], strides = [1, 1]} : vector<1x64xf32> to vector<1x32xf32>
    %8 = vector.extract_strided_slice %6 {offsets = [0, 32], sizes = [1, 32], strides = [1, 1]} : vector<1x64xf32> to vector<1x32xf32>
    %9 = arith.addf %7, %8 : vector<1x32xf32>
    %10 = vector.extract_strided_slice %9 {offsets = [0, 0], sizes = [1, 16], strides = [1, 1]} : vector<1x32xf32> to vector<1x16xf32>
    %11 = vector.extract_strided_slice %9 {offsets = [0, 16], sizes = [1, 16], strides = [1, 1]} : vector<1x32xf32> to vector<1x16xf32>
    %12 = arith.addf %10, %11 : vector<1x16xf32>
    %c0_1 = arith.constant 0 : index
    %c256 = arith.constant 256 : index
    %13 = vector.load %arg1[%c0_1, %c256] : memref<1x2048xf32, #tpu.memory_space<vmem>>, vector<1x256xf32>
    %14 = vector.extract_strided_slice %13 {offsets = [0, 0], sizes = [1, 128], strides = [1, 1]} : vector<1x256xf32> to vector<1x128xf32>
    %15 = vector.extract_strided_slice %13 {offsets = [0, 128], sizes = [1, 128], strides = [1, 1]} : vector<1x256xf32> to vector<1x128xf32>
    %16 = arith.addf %14, %15 : vector<1x128xf32>
    %17 = vector.extract_strided_slice %16 {offsets = [0, 0], sizes = [1, 64], strides = [1, 1]} : vector<1x128xf32> to vector<1x64xf32>
    %18 = vector.extract_strided_slice %16 {offsets = [0, 64], sizes = [1, 64], strides = [1, 1]} : vector<1x128xf32> to vector<1x64xf32>
    %19 = arith.addf %17, %18 : vector<1x64xf32>
    %20 = vector.extract_strided_slice %19 {offsets = [0, 0], sizes = [1, 32], strides = [1, 1]} : vector<1x64xf32> to vector<1x32xf32>
    %21 = vector.extract_strided_slice %19 {offsets = [0, 32], sizes = [1, 32], strides = [1, 1]} : vector<1x64xf32> to vector<1x32xf32>
    %22 = arith.addf %20, %21 : vector<1x32xf32>
    %23 = vector.extract_strided_slice %22 {offsets = [0, 0], sizes = [1, 16], strides = [1, 1]} : vector<1x32xf32> to vector<1x16xf32>
    %24 = vector.extract_strided_slice %22 {offsets = [0, 16], sizes = [1, 16], strides = [1, 1]} : vector<1x32xf32> to vector<1x16xf32>
    %25 = arith.addf %23, %24 : vector<1x16xf32>
    %c0_2 = arith.constant 0 : index
    %c512 = arith.constant 512 : index
    %26 = vector.load %arg1[%c0_2, %c512] : memref<1x2048xf32, #tpu.memory_space<vmem>>, vector<1x256xf32>
    %27 = vector.extract_strided_slice %26 {offsets = [0, 0], sizes = [1, 128], strides = [1, 1]} : vector<1x256xf32> to vector<1x128xf32>
    %28 = vector.extract_strided_slice %26 {offsets = [0, 128], sizes = [1, 128], strides = [1, 1]} : vector<1x256xf32> to vector<1x128xf32>
    %29 = arith.addf %27, %28 : vector<1x128xf32>
    %30 = vector.extract_strided_slice %29 {offsets = [0, 0], sizes = [1, 64], strides = [1, 1]} : vector<1x128xf32> to vector<1x64xf32>
    %31 = vector.extract_strided_slice %29 {offsets = [0, 64], sizes = [1, 64], strides = [1, 1]} : vector<1x128xf32> to vector<1x64xf32>
    %32 = arith.addf %30, %31 : vector<1x64xf32>
    %33 = vector.extract_strided_slice %32 {offsets = [0, 0], sizes = [1, 32], strides = [1, 1]} : vector<1x64xf32> to vector<1x32xf32>
    %34 = vector.extract_strided_slice %32 {offsets = [0, 32], sizes = [1, 32], strides = [1, 1]} : vector<1x64xf32> to vector<1x32xf32>
    %35 = arith.addf %33, %34 : vector<1x32xf32>
    %36 = vector.extract_strided_slice %35 {offsets = [0, 0], sizes = [1, 16], strides = [1, 1]} : vector<1x32xf32> to vector<1x16xf32>
    %37 = vector.extract_strided_slice %35 {offsets = [0, 16], sizes = [1, 16], strides = [1, 1]} : vector<1x32xf32> to vector<1x16xf32>
    %38 = arith.addf %36, %37 : vector<1x16xf32>
    %c0_3 = arith.constant 0 : index
    %c768 = arith.constant 768 : index
    %39 = vector.load %arg1[%c0_3, %c768] : memref<1x2048xf32, #tpu.memory_space<vmem>>, vector<1x256xf32>
    %40 = vector.extract_strided_slice %39 {offsets = [0, 0], sizes = [1, 128], strides = [1, 1]} : vector<1x256xf32> to vector<1x128xf32>
    %41 = vector.extract_strided_slice %39 {offsets = [0, 128], sizes = [1, 128], strides = [1, 1]} : vector<1x256xf32> to vector<1x128xf32>
    %42 = arith.addf %40, %41 : vector<1x128xf32>
    %43 = vector.extract_strided_slice %42 {offsets = [0, 0], sizes = [1, 64], strides = [1, 1]} : vector<1x128xf32> to vector<1x64xf32>
    %44 = vector.extract_strided_slice %42 {offsets = [0, 64], sizes = [1, 64], strides = [1, 1]} : vector<1x128xf32> to vector<1x64xf32>
    %45 = arith.addf %43, %44 : vector<1x64xf32>
    %46 = vector.extract_strided_slice %45 {offsets = [0, 0], sizes = [1, 32], strides = [1, 1]} : vector<1x64xf32> to vector<1x32xf32>
    %47 = vector.extract_strided_slice %45 {offsets = [0, 32], sizes = [1, 32], strides = [1, 1]} : vector<1x64xf32> to vector<1x32xf32>
    %48 = arith.addf %46, %47 : vector<1x32xf32>
    %49 = vector.extract_strided_slice %48 {offsets = [0, 0], sizes = [1, 16], strides = [1, 1]} : vector<1x32xf32> to vector<1x16xf32>
    %50 = vector.extract_strided_slice %48 {offsets = [0, 16], sizes = [1, 16], strides = [1, 1]} : vector<1x32xf32> to vector<1x16xf32>
    %51 = arith.addf %49, %50 : vector<1x16xf32>
    %c0_4 = arith.constant 0 : index
    %c1024 = arith.constant 1024 : index
    %52 = vector.load %arg1[%c0_4, %c1024] : memref<1x2048xf32, #tpu.memory_space<vmem>>, vector<1x256xf32>
    %53 = vector.extract_strided_slice %52 {offsets = [0, 0], sizes = [1, 128], strides = [1, 1]} : vector<1x256xf32> to vector<1x128xf32>
    %54 = vector.extract_strided_slice %52 {offsets = [0, 128], sizes = [1, 128], strides = [1, 1]} : vector<1x256xf32> to vector<1x128xf32>
    %55 = arith.addf %53, %54 : vector<1x128xf32>
    %56 = vector.extract_strided_slice %55 {offsets = [0, 0], sizes = [1, 64], strides = [1, 1]} : vector<1x128xf32> to vector<1x64xf32>
    %57 = vector.extract_strided_slice %55 {offsets = [0, 64], sizes = [1, 64], strides = [1, 1]} : vector<1x128xf32> to vector<1x64xf32>
    %58 = arith.addf %56, %57 : vector<1x64xf32>
    %59 = vector.extract_strided_slice %58 {offsets = [0, 0], sizes = [1, 32], strides = [1, 1]} : vector<1x64xf32> to vector<1x32xf32>
    %60 = vector.extract_strided_slice %58 {offsets = [0, 32], sizes = [1, 32], strides = [1, 1]} : vector<1x64xf32> to vector<1x32xf32>
    %61 = arith.addf %59, %60 : vector<1x32xf32>
    %62 = vector.extract_strided_slice %61 {offsets = [0, 0], sizes = [1, 16], strides = [1, 1]} : vector<1x32xf32> to vector<1x16xf32>
    %63 = vector.extract_strided_slice %61 {offsets = [0, 16], sizes = [1, 16], strides = [1, 1]} : vector<1x32xf32> to vector<1x16xf32>
    %64 = arith.addf %62, %63 : vector<1x16xf32>
    %c0_5 = arith.constant 0 : index
    %c1280 = arith.constant 1280 : index
    %65 = vector.load %arg1[%c0_5, %c1280] : memref<1x2048xf32, #tpu.memory_space<vmem>>, vector<1x256xf32>
    %66 = vector.extract_strided_slice %65 {offsets = [0, 0], sizes = [1, 128], strides = [1, 1]} : vector<1x256xf32> to vector<1x128xf32>
    %67 = vector.extract_strided_slice %65 {offsets = [0, 128], sizes = [1, 128], strides = [1, 1]} : vector<1x256xf32> to vector<1x128xf32>
    %68 = arith.addf %66, %67 : vector<1x128xf32>
    %69 = vector.extract_strided_slice %68 {offsets = [0, 0], sizes = [1, 64], strides = [1, 1]} : vector<1x128xf32> to vector<1x64xf32>
    %70 = vector.extract_strided_slice %68 {offsets = [0, 64], sizes = [1, 64], strides = [1, 1]} : vector<1x128xf32> to vector<1x64xf32>
    %71 = arith.addf %69, %70 : vector<1x64xf32>
    %72 = vector.extract_strided_slice %71 {offsets = [0, 0], sizes = [1, 32], strides = [1, 1]} : vector<1x64xf32> to vector<1x32xf32>
    %73 = vector.extract_strided_slice %71 {offsets = [0, 32], sizes = [1, 32], strides = [1, 1]} : vector<1x64xf32> to vector<1x32xf32>
    %74 = arith.addf %72, %73 : vector<1x32xf32>
    %75 = vector.extract_strided_slice %74 {offsets = [0, 0], sizes = [1, 16], strides = [1, 1]} : vector<1x32xf32> to vector<1x16xf32>
    %76 = vector.extract_strided_slice %74 {offsets = [0, 16], sizes = [1, 16], strides = [1, 1]} : vector<1x32xf32> to vector<1x16xf32>
    %77 = arith.addf %75, %76 : vector<1x16xf32>
    %c0_6 = arith.constant 0 : index
    %c1536 = arith.constant 1536 : index
    %78 = vector.load %arg1[%c0_6, %c1536] : memref<1x2048xf32, #tpu.memory_space<vmem>>, vector<1x256xf32>
    %79 = vector.extract_strided_slice %78 {offsets = [0, 0], sizes = [1, 128], strides = [1, 1]} : vector<1x256xf32> to vector<1x128xf32>
    %80 = vector.extract_strided_slice %78 {offsets = [0, 128], sizes = [1, 128], strides = [1, 1]} : vector<1x256xf32> to vector<1x128xf32>
    %81 = arith.addf %79, %80 : vector<1x128xf32>
    %82 = vector.extract_strided_slice %81 {offsets = [0, 0], sizes = [1, 64], strides = [1, 1]} : vector<1x128xf32> to vector<1x64xf32>
    %83 = vector.extract_strided_slice %81 {offsets = [0, 64], sizes = [1, 64], strides = [1, 1]} : vector<1x128xf32> to vector<1x64xf32>
    %84 = arith.addf %82, %83 : vector<1x64xf32>
    %85 = vector.extract_strided_slice %84 {offsets = [0, 0], sizes = [1, 32], strides = [1, 1]} : vector<1x64xf32> to vector<1x32xf32>
    %86 = vector.extract_strided_slice %84 {offsets = [0, 32], sizes = [1, 32], strides = [1, 1]} : vector<1x64xf32> to vector<1x32xf32>
    %87 = arith.addf %85, %86 : vector<1x32xf32>
    %88 = vector.extract_strided_slice %87 {offsets = [0, 0], sizes = [1, 16], strides = [1, 1]} : vector<1x32xf32> to vector<1x16xf32>
    %89 = vector.extract_strided_slice %87 {offsets = [0, 16], sizes = [1, 16], strides = [1, 1]} : vector<1x32xf32> to vector<1x16xf32>
    %90 = arith.addf %88, %89 : vector<1x16xf32>
    %c0_7 = arith.constant 0 : index
    %c1792 = arith.constant 1792 : index
    %91 = vector.load %arg1[%c0_7, %c1792] : memref<1x2048xf32, #tpu.memory_space<vmem>>, vector<1x256xf32>
    %92 = vector.extract_strided_slice %91 {offsets = [0, 0], sizes = [1, 128], strides = [1, 1]} : vector<1x256xf32> to vector<1x128xf32>
    %93 = vector.extract_strided_slice %91 {offsets = [0, 128], sizes = [1, 128], strides = [1, 1]} : vector<1x256xf32> to vector<1x128xf32>
    %94 = arith.addf %92, %93 : vector<1x128xf32>
    %95 = vector.extract_strided_slice %94 {offsets = [0, 0], sizes = [1, 64], strides = [1, 1]} : vector<1x128xf32> to vector<1x64xf32>
    %96 = vector.extract_strided_slice %94 {offsets = [0, 64], sizes = [1, 64], strides = [1, 1]} : vector<1x128xf32> to vector<1x64xf32>
    %97 = arith.addf %95, %96 : vector<1x64xf32>
    %98 = vector.extract_strided_slice %97 {offsets = [0, 0], sizes = [1, 32], strides = [1, 1]} : vector<1x64xf32> to vector<1x32xf32>
    %99 = vector.extract_strided_slice %97 {offsets = [0, 32], sizes = [1, 32], strides = [1, 1]} : vector<1x64xf32> to vector<1x32xf32>
    %100 = arith.addf %98, %99 : vector<1x32xf32>
    %101 = vector.extract_strided_slice %100 {offsets = [0, 0], sizes = [1, 16], strides = [1, 1]} : vector<1x32xf32> to vector<1x16xf32>
    %102 = vector.extract_strided_slice %100 {offsets = [0, 16], sizes = [1, 16], strides = [1, 1]} : vector<1x32xf32> to vector<1x16xf32>
    %103 = arith.addf %101, %102 : vector<1x16xf32>
    %104 = tpu.concatenate %12, %25, %38, %51, %64, %77, %90, %103 in 1 : vector<1x16xf32>, vector<1x16xf32>, vector<1x16xf32>, vector<1x16xf32>, vector<1x16xf32>, vector<1x16xf32>, vector<1x16xf32>, vector<1x16xf32> -> vector<1x128xf32>
    %cst = arith.constant 6.250000e-02 : f32
    %105 = vector.broadcast %cst : f32 to vector<1x128xf32>
    %106 = arith.mulf %104, %105 : vector<1x128xf32>
    %c0_8 = arith.constant 0 : index
    %c0_9 = arith.constant 0 : index
    %107 = vector.load %arg2[%c0_8, %c0_9] : memref<1x128xf32, #tpu.memory_space<vmem>>, vector<1x128xf32>
    tpu.vector_store %arg2[%c0_8, %c0_9], %106 {strides = array<i32>} : memref<1x128xf32, #tpu.memory_space<vmem>>, vector<1x128xf32>,
    return
  }
  func.func @transform_0(%arg0: i32) -> (i32, i32) {
    %c0_i32 = arith.constant 0 : i32
    %c0_i32_0 = arith.constant 0 : i32
    return %arg0, %c0_i32 : i32, i32
  }
  func.func @transform_1(%arg0: i32) -> (i32, i32) {
    %c0_i32 = arith.constant 0 : i32
    %c0_i32_0 = arith.constant 0 : i32
    return %arg0, %c0_i32 : i32, i32
  }
}

</mosaic_0001>

<bundles_post_ra>
// kernel: aggregator.1
= control target key start
LH: loop header
LB: loop body
LE: loop exit
PB: predicated region body
PF: predicated region fallthrough
CT: control target
= control target key end

     0   :  { %s230_s16 = smov 64   ;;  %s232_s23 = smov 112   ;;  %vm203_vm0 = vcmask 130048   ;;  %vm205_vm1 = vcmask 261120   ;;  %vm207_vm2 = vcmask 392192   ;;  %vm209_vm3 = vcmask 523264   ;;  %s301_s0 = inlined_call_operand.vmem [shape: f32[1,2048], index: 0, kind: input, shape index: {}]   ;;  %s302_s1 = inlined_call_operand.vmem [shape: f32[1,128], index: 1, kind: output, shape index: {}]  }
   0x1   :  { %v68_v0 = vld [vmem:[%s301_s0 + $0x6] sm:$0x3]  ;;  %v28_v1 = vld [vmem:[%s301_s0 + $0x2] sm:$0x3]  ;;  %v88_v4 = vld [vmem:[%s301_s0 + $0x8] sm:$0x3] }
   0x2   :  { %v70_v2 = vrot.slane %v68_v0, 1  ;;  %v30_v3 = vrot.slane %v28_v1, 1  ;;  %v48_v5 = vld [vmem:[%s301_s0 + $0x4] sm:$0x3]  ;;  %v108_v6 = vld [vmem:[%s301_s0 + $0xa] sm:$0x3] }
   0x3   :  { %v110_v9 = vrot.slane %v108_v6, 1  ;;  %v90_v10 = vrot.slane %v88_v4, 1  ;;  %v50_v11 = vrot.slane %v48_v5, 1  ;;  %v128_v12 = vld [vmem:[%s301_s0 + $0xc] sm:$0x3]  ;;  %s233_s24 = smov 16  }
   0x4   :  { %v72_v7 = vadd.f32 %v70_v2, %v68_v0  ;;  %v32_v8 = vadd.f32 %v30_v3, %v28_v1  ;;  %v130_v14 = vrot.slane %v128_v12, 1  ;;  %v148_v17 = vld [vmem:[%s301_s0 + $0xe] sm:$0x3]  ;;  %v8_v18 = vld [vmem:[%s301_s0] sm:$0x3]  ;;  %s231_s0 = smov 96  }
   0x5   :  { %v112_v13 = vadd.f32 %v110_v9, %v108_v6  ;;  %v92_v15 = vadd.f32 %v90_v10, %v88_v4  ;;  %v52_v16 = vadd.f32 %v50_v11, %v48_v5  ;;  %v150_v20 = vrot.slane %v148_v17, 1  ;;  %s234_s25 = smov 32   ;;  %s235_s26 = smov 80  }
   0x6   :  { %74 = vrot.lane.b32.xlu1 %v72_v7, %s230_s16  ;;  %34 = vrot.lane.b32.xlu0 %v32_v8, %s230_s16  ;;  %v132_v19 = vadd.f32 %v130_v14, %v128_v12  ;;  %v10_v21 = vrot.slane %v8_v18, 1  ;;  %s236_s27 = smov 48   ;;  %vm211_vm4 = vcmask 654336   ;;  %vm213_vm5 = vcmask 785408  }
   0x7   :  { %114 = vrot.lane.b32.xlu2 %v112_v13, %s230_s16  ;;  %v152_v22 = vadd.f32 %v150_v20, %v148_v17  ;;  %vm215_vm6 = vcmask 916480  }
   0x8   :  { %v12_v23 = vadd.f32 %v10_v21, %v8_v18 }
   0xe   :  { %94 = vrot.lane.b32.xlu1 %v92_v15, %s230_s16  ;;  %54 = vrot.lane.b32.xlu0 %v52_v16, %s230_s16 }
   0xf   :  { %134 = vrot.lane.b32.xlu2 %v132_v19, %s230_s16 }
  0x16   :  { %154 = vrot.lane.b32.xlu0 %v152_v22, %s230_s16  ;;  %14 = vrot.lane.b32.xlu1 %v12_v23, %s230_s16 }
  0x61   :  { %v115_v24 = vpop.permute.xlu2 %114 }
  0x62   :  { %v117_v36 = vadd.f32 %v115_v24, %v112_v13 }
  0x69   :  { %v135_v29 = vpop.permute.xlu2 %134 }
  0x6a   :  { %v137_v30 = vadd.f32 %v135_v29, %v132_v19 }
  0x78   :  { %v75_v25 = vpop.permute.xlu1 %74  ;;  %v35_v26 = vpop.permute.xlu0 %34 }
  0x79   :  { %v77_v27 = vadd.f32 %v75_v25, %v72_v7  ;;  %v37_v28 = vadd.f32 %v35_v26, %v32_v8 }
  0x7b   :  { %39 = vrot.lane.b32.xlu2 %v37_v28, %s231_s0  ;;  %79 = vrot.lane.b32.xlu1 %v77_v27, %s231_s0 }
  0x80   :  { %v95_v31 = vpop.permute.xlu1 %94  ;;  %v55_v32 = vpop.permute.xlu0 %54 }
  0x81   :  { %v97_v33 = vadd.f32 %v95_v31, %v92_v15  ;;  %v57_v34 = vadd.f32 %v55_v32, %v52_v16 }
  0x83   :  { %99 = vrot.lane.b32.xlu2 %v97_v33, %s231_s0  ;;  %59 = vrot.lane.b32.xlu0 %v57_v34, %s231_s0 }
  0x84   :  { %139 = vrot.lane.b32.xlu1 %v137_v30, %s231_s0 }
  0x88   :  { %v155_v35 = vpop.permute.xlu0 %154  ;;  %v15_v38 = vpop.permute.xlu1 %14 }
  0x89   :  { %v157_v37 = vadd.f32 %v155_v35, %v152_v22  ;;  %v17_v39 = vadd.f32 %v15_v38, %v12_v23 }
  0x8b   :  { %119 = vrot.lane.b32.xlu0 %v117_v36, %s231_s0  ;;  %159 = vrot.lane.b32.xlu2 %v157_v37, %s231_s0 }
  0x93   :  { %19 = vrot.lane.b32.xlu0 %v17_v39, %s231_s0 }
  0xd5   :  { %v40_v40 = vpop.permute.xlu2 %39 }
  0xd6   :  { %v42_v41 = vadd.f32 %v40_v40, %v37_v28 }
  0xd8   :  { %44 = vrot.lane.b32.xlu1 %v42_v41, %s232_s23 }
  0xdd   :  { %v100_v42 = vpop.permute.xlu2 %99 }
  0xde   :  { %v102_v43 = vadd.f32 %v100_v42, %v97_v33 }
  0xe0   :  { %104 = vrot.lane.b32.xlu1 %v102_v43, %s232_s23 }
  0xe5   :  { %v160_v44 = vpop.permute.xlu2 %159 }
  0xe6   :  { %v162_v45 = vadd.f32 %v160_v44, %v157_v37 }
  0xe8   :  { %164 = vrot.lane.b32.xlu1 %v162_v45, %s232_s23 }
  0xed   :  { %v80_v46 = vpop.permute.xlu1 %79 }
  0xee   :  { %v82_v47 = vadd.f32 %v80_v46, %v77_v27 }
  0xf0   :  { %84 = vrot.lane.b32.xlu0 %v82_v47, %s232_s23 }
  0xf5   :  { %v60_v48 = vpop.permute.xlu0 %59 }
  0xf6   :  { %v62_v49 = vadd.f32 %v60_v48, %v57_v34  ;;  %v140_v50 = vpop.permute.xlu1 %139 }
  0xf7   :  { %v142_v51 = vadd.f32 %v140_v50, %v137_v30 }
  0xf8   :  { %64 = vrot.lane.b32.xlu2 %v62_v49, %s232_s23 }
  0xf9   :  { %144 = vrot.lane.b32.xlu0 %v142_v51, %s232_s23 }
  0xfd   :  { %v120_v52 = vpop.permute.xlu0 %119 }
  0xfe   :  { %v122_v53 = vadd.f32 %v120_v52, %v117_v36 }
 0x100   :  { %124 = vrot.lane.b32.xlu2 %v122_v53, %s232_s23 }
 0x105   :  { %v20_v54 = vpop.permute.xlu0 %19 }
 0x106   :  { %v22_v55 = vadd.f32 %v20_v54, %v17_v39 }
 0x108   :  { %24 = vrot.lane.b32.xlu2 %v22_v55, %s232_s23 }
 0x14a   :  { %v45_v56 = vpop.permute.xlu1 %44 }
 0x14b   :  { %v47_v57 = vadd.f32 %v45_v56, %v42_v41 }
 0x14d   :  { %v169_v58 = vperm.slane %v47_v57, 0 }
 0x14f   :  { %170 = vrot.lane.b32.xlu0 %v169_v58, %s233_s24 }
 0x152   :  { %v65_v59 = vpop.permute.xlu2 %64  ;;  %v105_v60 = vpop.permute.xlu1 %104 }
 0x153   :  { %v67_v61 = vadd.f32 %v65_v59, %v62_v49  ;;  %v107_v62 = vadd.f32 %v105_v60, %v102_v43 }
 0x155   :  { %v174_v63 = vperm.slane %v67_v61, 0  ;;  %v184_v0 = vperm.slane %v107_v62, 0 }
 0x157   :  { %175 = vrot.lane.b32.xlu1 %v174_v63, %s234_s25  ;;  %185 = vrot.lane.b32.xlu0 %v184_v0, %s230_s16 }
 0x15a   :  { %v125_v1 = vpop.permute.xlu2 %124  ;;  %v165_v2 = vpop.permute.xlu1 %164 }
 0x15b   :  { %v127_v3 = vadd.f32 %v125_v1, %v122_v53  ;;  %v167_v4 = vadd.f32 %v165_v2, %v162_v45 }
 0x15d   :  { %v189_v5 = vperm.slane %v127_v3, 0  ;;  %v199_v6 = vperm.slane %v167_v4, 0 }
 0x15f   :  { %190 = vrot.lane.b32.xlu1 %v189_v5, %s235_s26  ;;  %200 = vrot.lane.b32.xlu0 %v199_v6, %s232_s23 }
 0x162   :  { %v85_v7 = vpop.permute.xlu0 %84  ;;  %v25_v13 = vpop.permute.xlu2 %24 }
 0x163   :  { %v87_v8 = vadd.f32 %v85_v7, %v82_v47  ;;  %v27_v15 = vadd.f32 %v25_v13, %v22_v55 }
 0x165   :  { %v179_v9 = vperm.slane %v87_v8, 0 }
 0x167   :  { %180 = vrot.lane.b32.xlu2 %v179_v9, %s236_s27 }
 0x16b   :  { %v145_v10 = vpop.permute.xlu0 %144 }
 0x16c   :  { %v147_v11 = vadd.f32 %v145_v10, %v142_v51 }
 0x16e   :  { %v194_v12 = vperm.slane %v147_v11, 0 }
 0x170   :  { %195 = vrot.lane.b32.xlu2 %v194_v12, %s231_s0 }
 0x1c1   :  { %v171_v14 = vpop.permute.xlu0 %170  ;;  %v181_v16 = vpop.permute.xlu2 %180 }
 0x1c2   :  { %v204_v19 = vsel %vm203_vm0, %v27_v15, %v171_v14 }
 0x1c9   :  { %v186_v17 = vpop.permute.xlu0 %185  ;;  %v176_v18 = vpop.permute.xlu1 %175 }
 0x1ca   :  { %v206_v20 = vsel %vm205_vm1, %v204_v19, %v176_v18  ;;  %v196_v24 = vpop.permute.xlu2 %195 }
 0x1cb   :  { %v208_v21 = vsel %vm207_vm2, %v206_v20, %v181_v16 }
 0x1cc   :  { %v210_v22 = vsel %vm209_vm3, %v208_v21, %v186_v17 }
 0x1d1   :  { %v191_v23 = vpop.permute.xlu1 %190  ;;  %v201_v26 = vpop.permute.xlu0 %200 }
 0x1d2   :  { %v212_v25 = vsel %vm211_vm4, %v210_v22, %v191_v23 }
 0x1d3   :  { %v214_v27 = vsel %vm213_vm5, %v212_v25, %v196_v24 }
 0x1d4   :  { %v216_v28 = vsel %vm215_vm6, %v214_v27, %v201_v26 }
 0x1d5   :  { %v217_v29 = vmul.f32 0.0625, %v216_v28 }
 0x1d7   :  { %218 = vst [vmem:[%s302_s1] sm:$0x1] %v217_v29 }

</bundles_post_ra>
